<compile_context>
chip_gen: v7x
topology: tpu7x:2x2x1
jax: 0.10.0
libtpu: 0.0.40
codegen_flags: <defaults>
</compile_context>

<pallas_src>
import jax
import jax.numpy as jnp
from jax.experimental import pallas as pl
from jax.experimental.pallas import tpu as pltpu


def _round_up(n, m):
    return ((n + m - 1) // m) * m


def _vmem_capacity_bytes():
    """Per-TensorCore VMEM capacity; conservative 64 MiB (v7x size) fallback."""
    try:
        cap = getattr(pltpu.get_tpu_info(), "vmem_capacity_bytes", None)
        if cap:
            return int(cap)
    except Exception:
        pass
    return 64 << 20


def _vmem_bytes(bt, Dp, Up, Op, inv_bufs):
    """f32 VMEM footprint: pipelined x/out tiles, resident params, and the
    (bt, Up) in-kernel intermediates (xc, sq_dist, dist, phi)."""
    return 4 * (
        2 * bt * Dp                              # x tile, double-buffered
        + 2 * bt * Op                            # out tile, double-buffered
        + inv_bufs * (Dp * Up + Up + Up * Op)    # c_t, -betas, W^T(+bias)
        + 4 * bt * Up                            # kernel temporaries
    )


def rbf_network_kernel(x_ref, ct_ref, nbeta_ref, w_ref, out_ref):
    """One batch tile of  out = exp(-betas * ||x - c||) @ W^T + bias.

    x_ref    : (bt, Dp)  inputs; column D holds the homogeneous 1.0
    ct_ref   : (Dp, Up)  [-2*c^T ; ||c||^2 row], zero padding elsewhere
    nbeta_ref: (1,  Up)  -betas (zero in padded columns)
    w_ref    : (Up, Op)  W^T with the bias in row U (padded phi columns == 1)
    """
    x = x_ref[...]

    # MXU: xc = -2 x.c + ||c||^2 in one matmul (constants folded into c_t).
    xc = jnp.dot(x, ct_ref[...], preferred_element_type=jnp.float32)   # (bt, Up)

    # ||x||^2; subtract the homogeneous column's exact 1.0 contribution.
    x_norm = jnp.sum(x * x, axis=-1, keepdims=True) - 1.0              # (bt, 1)

    # Squared distance (clamped against FP cancellation), then EUP sqrt + exp.
    sq_dist = jnp.maximum(x_norm + xc, 0.0)                            # (bt, Up)
    dist = jnp.sqrt(sq_dist)
    phi = jnp.exp(nbeta_ref[...] * dist)                               # (bt, Up)

    # MXU: linear layer; bias comes from w_ref row U since phi[:, U] == 1.
    out_ref[...] = jnp.dot(phi, w_ref[...], preferred_element_type=jnp.float32)


def prepare_rbf_params(centers, betas, w, b):
    """Build the padded, MXU-ready constants ONCE (hoisted out of the call path)."""
    U, D = centers.shape
    O, _ = w.shape
    Dp = _round_up(D + 1, 128)   # +1 spare column -> homogeneous coordinate
    Up = _round_up(U + 1, 128)   # +1 spare row    -> fused bias
    Op = _round_up(O, 128)

    f32 = jnp.float32
    centers = centers.astype(f32)
    c_norm = jnp.sum(centers * centers, axis=1)                        # (U,)

    c_t = jnp.zeros((Dp, Up), f32)
    c_t = c_t.at[:D, :U].set(-2.0 * centers.T)                         # -2 c^T
    c_t = c_t.at[D, :U].set(c_norm)                                    # + ||c||^2

    nbeta = jnp.zeros((1, Up), f32).at[0, :U].set(-betas.astype(f32))

    w_t = jnp.zeros((Up, Op), f32)
    w_t = w_t.at[:U, :O].set(w.astype(f32).T)
    w_t = w_t.at[U, :O].set(b.astype(f32))                             # bias row

    dims = dict(D=D, U=U, O=O, Dp=Dp, Up=Up, Op=Op)
    return dict(c_t=c_t, nbeta=nbeta, w_t=w_t, dims=dims)


def _run(x_p, params, B, batch_tile, single_buffer_invariants):
    dims = params["dims"]
    Dp, Up, Op = dims["Dp"], dims["Up"], dims["Op"]

    inv_bufs = 1 if single_buffer_invariants else 2
    cap = _vmem_capacity_bytes()
    budget = int(cap * 0.80)   # headroom for Mosaic internal scratch/semaphores

    # Largest batch tile (multiple of 8, <= requested, <= batch) that fits VMEM.
    bt = max(8, min(_round_up(batch_tile, 8), _round_up(B, 8)))
    while bt > 8 and _vmem_bytes(bt, Dp, Up, Op, inv_bufs) > budget:
        bt = max(8, _round_up(bt // 2, 8))
    # Note: for very large rbf_units (resident c_t/W^T near the per-core VMEM
    # budget, esp. v7x 64 MiB) a second "arbitrary" grid axis tiling Up with an
    # accumulator scratch would be needed; not required at these model sizes.

    vmem_limit = int(min(budget, max(2 * _vmem_bytes(bt, Dp, Up, Op, inv_bufs), 8 << 20)))

    cost = pl.CostEstimate(
        flops=int(2 * B * Up * (Dp + Op)),
        transcendentals=int(2 * B * Up),
        bytes_accessed=int(4 * (B * Dp + Dp * Up + Up + Up * Op + B * Op)),
    )

    inv_kwargs = dict(pipeline_mode=pl.Buffered(1)) if single_buffer_invariants else {}

    return pl.pallas_call(
        rbf_network_kernel,
        out_shape=jax.ShapeDtypeStruct((B, Op), jnp.float32),
        grid_spec=pltpu.PrefetchScalarGridSpec(
            num_scalar_prefetch=0,
            grid=(pl.cdiv(B, bt),),
            in_specs=[
                pl.BlockSpec((bt, Dp), lambda i: (i, 0)),                # x tile
                pl.BlockSpec((Dp, Up), lambda i: (0, 0), **inv_kwargs),  # [-2c^T ; ||c||^2]
                pl.BlockSpec((1, Up), lambda i: (0, 0), **inv_kwargs),   # -betas
                pl.BlockSpec((Up, Op), lambda i: (0, 0), **inv_kwargs),  # W^T (+bias row)
            ],
            out_specs=pl.BlockSpec((bt, Op), lambda i: (i, 0)),
        ),
        compiler_params=pltpu.CompilerParams(
            dimension_semantics=("parallel",),
            vmem_limit_bytes=vmem_limit,
        ),
        cost_estimate=cost,
    )(x_p, params["c_t"], params["nbeta"], params["w_t"])


def rbf_network_forward(x, params, *, batch_tile=512):
    """RBFNetwork forward: exp(-betas * ||x - centers||) @ W^T + b."""
    dims = params["dims"]
    D, O, Dp = dims["D"], dims["O"], dims["Dp"]
    B = x.shape[0]
    assert x.shape[1] == D

    # Only x needs per-call padding (lane alignment + the homogeneous 1-column);
    # the batch axis is left unpadded (partial last tile handled by Pallas).
    x_p = jnp.zeros((B, Dp), jnp.float32)
    x_p = x_p.at[:, :D].set(x.astype(jnp.float32))
    x_p = x_p.at[:, D].set(1.0)

    try:
        out_p = _run(x_p, params, B, batch_tile, single_buffer_invariants=True)
    except Exception:
        # Fallback if this JAX/Mosaic build rejects pl.Buffered(1) on pallas_call specs.
        out_p = _run(x_p, params, B, batch_tile, single_buffer_invariants=False)

    return out_p[:, :O]


def rbf_network_reference(x, centers, betas, w, b):
    """Pure-JAX reference matching the PyTorch module exactly."""
    diff = x[:, None, :] - centers[None, :, :]
    dist = jnp.sqrt(jnp.sum(diff * diff, axis=-1))
    phi = jnp.exp(-betas[None, :] * dist)
    return phi @ w.T + b[None, :]


if __name__ == "__main__":
    # Small shapes consistent with RBFNetwork(input_dim, rbf_units, output_dim).
    B, D, U, O = 16, 16, 32, 8

    key = jax.random.PRNGKey(0)
    k_x, k_c, k_w, k_b = jax.random.split(key, 4)

    x = jax.random.normal(k_x, (B, D), dtype=jnp.float32)

    # Deterministic parameter init mirroring the PyTorch module's __init__:
    #   centers ~ U(0, 1), betas = 1, Linear default ~ U(-1/sqrt(U), 1/sqrt(U)).
    centers = jax.random.uniform(k_c, (U, D), dtype=jnp.float32, minval=0.0, maxval=1.0)
    betas = jnp.ones((U,), dtype=jnp.float32)
    bound = 1.0 / float(jnp.sqrt(jnp.float32(U)))
    w = jax.random.uniform(k_w, (O, U), dtype=jnp.float32, minval=-bound, maxval=bound)
    b = jax.random.uniform(k_b, (O,), dtype=jnp.float32, minval=-bound, maxval=bound)

    params = prepare_rbf_params(centers, betas, w, b)   # built once, reused per forward
    out = rbf_network_forward(x, params)
    out = jax.block_until_ready(out)

    ref = rbf_network_reference(x, centers, betas, w, b)
    assert out.shape == (B, O)
    assert jnp.allclose(out, ref, atol=1e-4, rtol=1e-4), "mismatch vs reference"

    print("KERNEL_OK")
</pallas_src>

<mosaic_0001>
module attributes {stable_mosaic.version = 11 : i64} {
  func.func @rbf_network_kernel(%arg0: i32, %arg1: memref<16x128xf32, #tpu.memory_space<vmem>>, %arg2: memref<128x128xf32, #tpu.memory_space<vmem>>, %arg3: memref<1x128xf32, #tpu.memory_space<vmem>>, %arg4: memref<128x128xf32, #tpu.memory_space<vmem>>, %arg5: memref<16x128xf32, #tpu.memory_space<vmem>>) attributes {dimension_semantics = [#tpu.dimension_semantics<parallel>], iteration_bounds = array<i64: 1>, scalar_prefetch = 0 : i64, scratch_operands = 0 : i64, tpu.core_type = #tpu.core_type<tc>, window_params = [{transform_indices = @transform_0, window_bounds = array<i64: 16, 128>}, {pipeline_mode = #tpu.pipeline_mode<synchronous>, transform_indices = @transform_1, window_bounds = array<i64: 128, 128>}, {pipeline_mode = #tpu.pipeline_mode<synchronous>, transform_indices = @transform_2, window_bounds = array<i64: 1, 128>}, {pipeline_mode = #tpu.pipeline_mode<synchronous>, transform_indices = @transform_3, window_bounds = array<i64: 128, 128>}, {transform_indices = @transform_4, window_bounds = array<i64: 16, 128>}]} {
    %c0 = arith.constant 0 : index
    %c0_0 = arith.constant 0 : index
    %0 = vector.load %arg1[%c0, %c0_0] : memref<16x128xf32, #tpu.memory_space<vmem>>, vector<16x128xf32>
    %c0_1 = arith.constant 0 : index
    %c0_2 = arith.constant 0 : index
    %1 = vector.load %arg2[%c0_1, %c0_2] : memref<128x128xf32, #tpu.memory_space<vmem>>, vector<128x128xf32>
    %cst = arith.constant dense<0.000000e+00> : vector<16x128xf32>
    %2 = tpu.matmul %0, %1, %cst {dimension_numbers = #tpu.dot_dimension_numbers<[1], [0], [0], [1], [0, 0, 1, 1], [], []>} : vector<16x128xf32>, vector<128x128xf32>, vector<16x128xf32> -> vector<16x128xf32>
    %3 = arith.mulf %0, %0 : vector<16x128xf32>
    %cst_3 = arith.constant dense<0.000000e+00> : vector<16xf32>
    %4 = vector.multi_reduction <add>, %3, %cst_3 [1] : vector<16x128xf32> to vector<16xf32>
    %5 = vector.shape_cast %4 : vector<16xf32> to vector<16x1xf32>
    %cst_4 = arith.constant 1.000000e+00 : f32
    %6 = vector.broadcast %cst_4 : f32 to vector<16x1xf32>
    %7 = arith.subf %5, %6 : vector<16x1xf32>
    %8 = vector.broadcast %7 : vector<16x1xf32> to vector<16x128xf32>
    %9 = arith.addf %8, %2 : vector<16x128xf32>
    %cst_5 = arith.constant 0.000000e+00 : f32
    %10 = vector.broadcast %cst_5 : f32 to vector<16x128xf32>
    %11 = arith.maximumf %9, %10 : vector<16x128xf32>
    %12 = math.sqrt %11 : vector<16x128xf32>
    %c0_6 = arith.constant 0 : index
    %c0_7 = arith.constant 0 : index
    %13 = vector.load %arg3[%c0_6, %c0_7] : memref<1x128xf32, #tpu.memory_space<vmem>>, vector<1x128xf32>
    %14 = vector.broadcast %13 : vector<1x128xf32> to vector<16x128xf32>
    %15 = arith.mulf %14, %12 : vector<16x128xf32>
    %16 = math.exp %15 : vector<16x128xf32>
    %c0_8 = arith.constant 0 : index
    %c0_9 = arith.constant 0 : index
    %17 = vector.load %arg4[%c0_8, %c0_9] : memref<128x128xf32, #tpu.memory_space<vmem>>, vector<128x128xf32>
    %cst_10 = arith.constant dense<0.000000e+00> : vector<16x128xf32>
    %18 = tpu.matmul %16, %17, %cst_10 {dimension_numbers = #tpu.dot_dimension_numbers<[1], [0], [0], [1], [0, 0, 1, 1], [], []>} : vector<16x128xf32>, vector<128x128xf32>, vector<16x128xf32> -> vector<16x128xf32>
    %c0_11 = arith.constant 0 : index
    %c0_12 = arith.constant 0 : index
    %19 = vector.load %arg5[%c0_11, %c0_12] : memref<16x128xf32, #tpu.memory_space<vmem>>, vector<16x128xf32>
    tpu.vector_store %arg5[%c0_11, %c0_12], %18 {strides = array<i32>} : memref<16x128xf32, #tpu.memory_space<vmem>>, vector<16x128xf32>,
    return
  }
  func.func @transform_0(%arg0: i32) -> (i32, i32) {
    %c0_i32 = arith.constant 0 : i32
    %c0_i32_0 = arith.constant 0 : i32
    return %arg0, %c0_i32 : i32, i32
  }
  func.func @transform_1(%arg0: i32) -> (i32, i32) {
    %c0_i32 = arith.constant 0 : i32
    %c0_i32_0 = arith.constant 0 : i32
    %c0_i32_1 = arith.constant 0 : i32
    return %c0_i32, %c0_i32_0 : i32, i32
  }
  func.func @transform_2(%arg0: i32) -> (i32, i32) {
    %c0_i32 = arith.constant 0 : i32
    %c0_i32_0 = arith.constant 0 : i32
    %c0_i32_1 = arith.constant 0 : i32
    return %c0_i32, %c0_i32_0 : i32, i32
  }
  func.func @transform_3(%arg0: i32) -> (i32, i32) {
    %c0_i32 = arith.constant 0 : i32
    %c0_i32_0 = arith.constant 0 : i32
    %c0_i32_1 = arith.constant 0 : i32
    return %c0_i32, %c0_i32_0 : i32, i32
  }
  func.func @transform_4(%arg0: i32) -> (i32, i32) {
    %c0_i32 = arith.constant 0 : i32
    %c0_i32_0 = arith.constant 0 : i32
    return %arg0, %c0_i32 : i32, i32
  }
}

module attributes {stable_mosaic.version = 11 : i64} {
  func.func @rbf_network_kernel(%arg0: i32, %arg1: memref<16x128xf32, #tpu.memory_space<vmem>>, %arg2: memref<128x128xf32, #tpu.memory_space<vmem>>, %arg3: memref<1x128xf32, #tpu.memory_space<vmem>>, %arg4: memref<128x128xf32, #tpu.memory_space<vmem>>, %arg5: memref<16x128xf32, #tpu.memory_space<vmem>>) attributes {dimension_semantics = [#tpu.dimension_semantics<parallel>], iteration_bounds = array<i64: 1>, scalar_prefetch = 0 : i64, scratch_operands = 0 : i64, tpu.core_type = #tpu.core_type<tc>, window_params = [{transform_indices = @transform_0, window_bounds = array<i64: 16, 128>}, {pipeline_mode = #tpu.pipeline_mode<synchronous>, transform_indices = @transform_1, window_bounds = array<i64: 128, 128>}, {pipeline_mode = #tpu.pipeline_mode<synchronous>, transform_indices = @transform_2, window_bounds = array<i64: 1, 128>}, {pipeline_mode = #tpu.pipeline_mode<synchronous>, transform_indices = @transform_3, window_bounds = array<i64: 128, 128>}, {transform_indices = @transform_4, window_bounds = array<i64: 16, 128>}]} {
    %c0 = arith.constant 0 : index
    %c0_0 = arith.constant 0 : index
    %0 = vector.load %arg1[%c0, %c0_0] : memref<16x128xf32, #tpu.memory_space<vmem>>, vector<16x128xf32>
    %c0_1 = arith.constant 0 : index
    %c0_2 = arith.constant 0 : index
    %1 = vector.load %arg2[%c0_1, %c0_2] : memref<128x128xf32, #tpu.memory_space<vmem>>, vector<128x128xf32>
    %cst = arith.constant dense<0.000000e+00> : vector<16x128xf32>
    %2 = tpu.matmul %0, %1, %cst {dimension_numbers = #tpu.dot_dimension_numbers<[1], [0], [0], [1], [0, 0, 1, 1], [], []>} : vector<16x128xf32>, vector<128x128xf32>, vector<16x128xf32> -> vector<16x128xf32>
    %3 = arith.mulf %0, %0 : vector<16x128xf32>
    %cst_3 = arith.constant dense<0.000000e+00> : vector<16xf32>
    %4 = vector.multi_reduction <add>, %3, %cst_3 [1] : vector<16x128xf32> to vector<16xf32>
    %5 = vector.shape_cast %4 : vector<16xf32> to vector<16x1xf32>
    %cst_4 = arith.constant 1.000000e+00 : f32
    %6 = vector.broadcast %cst_4 : f32 to vector<16x1xf32>
    %7 = arith.subf %5, %6 : vector<16x1xf32>
    %8 = vector.broadcast %7 : vector<16x1xf32> to vector<16x128xf32>
    %9 = arith.addf %8, %2 : vector<16x128xf32>
    %cst_5 = arith.constant 0.000000e+00 : f32
    %10 = vector.broadcast %cst_5 : f32 to vector<16x128xf32>
    %11 = arith.maximumf %9, %10 : vector<16x128xf32>
    %12 = math.sqrt %11 : vector<16x128xf32>
    %c0_6 = arith.constant 0 : index
    %c0_7 = arith.constant 0 : index
    %13 = vector.load %arg3[%c0_6, %c0_7] : memref<1x128xf32, #tpu.memory_space<vmem>>, vector<1x128xf32>
    %14 = vector.broadcast %13 : vector<1x128xf32> to vector<16x128xf32>
    %15 = arith.mulf %14, %12 : vector<16x128xf32>
    %16 = math.exp %15 : vector<16x128xf32>
    %c0_8 = arith.constant 0 : index
    %c0_9 = arith.constant 0 : index
    %17 = vector.load %arg4[%c0_8, %c0_9] : memref<128x128xf32, #tpu.memory_space<vmem>>, vector<128x128xf32>
    %cst_10 = arith.constant dense<0.000000e+00> : vector<16x128xf32>
    %18 = tpu.matmul %16, %17, %cst_10 {dimension_numbers = #tpu.dot_dimension_numbers<[1], [0], [0], [1], [0, 0, 1, 1], [], []>} : vector<16x128xf32>, vector<128x128xf32>, vector<16x128xf32> -> vector<16x128xf32>
    %c0_11 = arith.constant 0 : index
    %c0_12 = arith.constant 0 : index
    %19 = vector.load %arg5[%c0_11, %c0_12] : memref<16x128xf32, #tpu.memory_space<vmem>>, vector<16x128xf32>
    tpu.vector_store %arg5[%c0_11, %c0_12], %18 {strides = array<i32>} : memref<16x128xf32, #tpu.memory_space<vmem>>, vector<16x128xf32>,
    return
  }
  func.func @transform_0(%arg0: i32) -> (i32, i32) {
    %c0_i32 = arith.constant 0 : i32
    %c0_i32_0 = arith.constant 0 : i32
    return %arg0, %c0_i32 : i32, i32
  }
  func.func @transform_1(%arg0: i32) -> (i32, i32) {
    %c0_i32 = arith.constant 0 : i32
    %c0_i32_0 = arith.constant 0 : i32
    %c0_i32_1 = arith.constant 0 : i32
    return %c0_i32, %c0_i32_0 : i32, i32
  }
  func.func @transform_2(%arg0: i32) -> (i32, i32) {
    %c0_i32 = arith.constant 0 : i32
    %c0_i32_0 = arith.constant 0 : i32
    %c0_i32_1 = arith.constant 0 : i32
    return %c0_i32, %c0_i32_0 : i32, i32
  }
  func.func @transform_3(%arg0: i32) -> (i32, i32) {
    %c0_i32 = arith.constant 0 : i32
    %c0_i32_0 = arith.constant 0 : i32
    %c0_i32_1 = arith.constant 0 : i32
    return %c0_i32, %c0_i32_0 : i32, i32
  }
  func.func @transform_4(%arg0: i32) -> (i32, i32) {
    %c0_i32 = arith.constant 0 : i32
    %c0_i32_0 = arith.constant 0 : i32
    return %arg0, %c0_i32 : i32, i32
  }
}

</mosaic_0001>

<bundles_post_ra>
// kernel: tpu_custom_call.1
= control target key start
LH: loop header
LB: loop body
LE: loop exit
PB: predicated region body
PF: predicated region fallthrough
CT: control target
= control target key end

     0   :  { %9 = vsyncpa [#allocation3], 0  ;;  %s684_s0 = inlined_call_operand.hbm [shape: f32[16,128], index: 0, kind: input, shape index: {}]   ;;  %s685_s1 = inlined_call_operand.hbm [shape: f32[128,128], index: 1, kind: input, shape index: {}]   ;;  %s686_s2 = inlined_call_operand.vmem [shape: f32[1,128], index: 2, kind: input, shape index: {}]   ;;  %s687_s3 = inlined_call_operand.hbm [shape: f32[128,128], index: 3, kind: input, shape index: {}]   ;;  %s688_s4 = inlined_call_operand.hbm [shape: f32[16,128], index: 4, kind: output, shape index: {}]  }
   0x1   :  { %10 = vsyncpa [#allocation6], 0 }
   0x2   :  { %11 = vsyncpa [#allocation4], 0  ;;  %s583_s15 = smov [#allocation5]   ;;  %s584_s17 = smov [#allocation2]  }
   0x3   :  { %s29_s16 = sshll.u32 %s583_s15, 4  ;;  %s17_s18 = sshll.u32 %s584_s17, 4  ;;  %s30_s16 = int_to_ptr.vmem [resolvable:$true] %s29_s16  ;;  %s614_s18 = int_to_ptr.vmem [resolvable:$true] %s17_s18 }
   0x4   :  { %s489_s21 = scalar_lea.hbm %s685_s1, 2048 }
   0x5   :  { %p490_p0 = scmp.ne.s32.totalorder %s685_s1, %s489_s21  ;;  %p493_p1 = scmp.lt.u32.totalorder %s489_s21, %s685_s1 }
   0x7   :  { %p495_p2 = pnand %p493_p1, %p490_p0 }
   0x9   :  { %498 = shalt.err (!%p495_p2)
}
   0xa   :  { %s499_s26 = scalar_lea.vmem %s30_s16, 2048  ;;  %p504_p4 = scmp.lt.s32.totalorder %s30_s16, %s30_s16 }
   0xb   :  { %p500_p3 = scmp.ne.s32.totalorder %s30_s16, %s499_s26  ;;  %p505_p5 = scmp.lt.s32.totalorder %s499_s26, %s499_s26 }
   0xd   :  { %p506_p6 = por %p505_p5, %p504_p4 }
   0xf   :  { %p507_p7 = pnand %p506_p6, %p500_p3 }
  0x11   :  { %510 = shalt.err (!%p507_p7)
}
  0x12   :  { %s585_s27 = smov 128   ;;  %s586_s28 = smov 8  }
  0x13   :  { %35 = dma.hbm_to_vmem [thread:$0]  %s685_s1, 2048, %s30_s16, [#allocation6], %s585_s27, %s585_s27, %s586_s28  }
  0x14   :  { %s511_s7 = scalar_lea.hbm %s684_s0, 256 }
  0x15   :  { %p512_p8 = scmp.ne.s32.totalorder %s684_s0, %s511_s7  ;;  %p515_p9 = scmp.lt.u32.totalorder %s511_s7, %s684_s0 }
  0x17   :  { %p517_p10 = pnand %p515_p9, %p512_p8 }
  0x19   :  { %520 = shalt.err (!%p517_p10)
}
  0x1a   :  { %s521_s12 = scalar_lea.vmem %s614_s18, 256  ;;  %p526_p12 = scmp.lt.s32.totalorder %s614_s18, %s614_s18 }
  0x1b   :  { %p522_p11 = scmp.ne.s32.totalorder %s614_s18, %s521_s12  ;;  %p527_p13 = scmp.lt.s32.totalorder %s521_s12, %s521_s12 }
  0x1d   :  { %p528_p0 = por %p527_p13, %p526_p12 }
  0x1f   :  { %p529_p1 = pnand %p528_p0, %p522_p11 }
  0x21   :  { %532 = shalt.err (!%p529_p1)
}
  0x22   :  { %23 = dma.hbm_to_vmem [thread:$0]  %s684_s0, 256, %s614_s18, [#allocation3], %s585_s27, %s585_s27, %s586_s28  }
  0x23   :  { %s587_s14 = smov [#allocation7]   ;;  %s533_s19 = scalar_lea.hbm %s687_s3, 2048 }
  0x24   :  { %s43_s15 = sshll.u32 %s587_s14, 4  ;;  %p534_p2 = scmp.ne.s32.totalorder %s687_s3, %s533_s19  ;;  %s44_s15 = int_to_ptr.vmem [resolvable:$true] %s43_s15 }
  0x25   :  { %p537_p3 = scmp.lt.u32.totalorder %s533_s19, %s687_s3 }
  0x27   :  { %p539_p4 = pnand %p537_p3, %p534_p2 }
  0x29   :  { %542 = shalt.err (!%p539_p4)
}
  0x2a   :  { %s543_s24 = scalar_lea.vmem %s44_s15, 2048  ;;  %p548_p6 = scmp.lt.s32.totalorder %s44_s15, %s44_s15 }
  0x2b   :  { %p544_p5 = scmp.ne.s32.totalorder %s44_s15, %s543_s24  ;;  %p549_p7 = scmp.lt.s32.totalorder %s543_s24, %s543_s24 }
  0x2d   :  { %p550_p8 = por %p549_p7, %p548_p6 }
  0x2f   :  { %p551_p9 = pnand %p550_p8, %p544_p5 }
  0x31   :  { %554 = shalt.err (!%p551_p9)
}
  0x32   :  { %49 = dma.hbm_to_vmem [thread:$0]  %s687_s3, 2048, %s44_s15, [#allocation6], %s585_s27, %s585_s27, %s586_s28  }
  0x33   :  { %577 = dma.done.wait [#allocation3], 256  }
  0x34   :  { %578 = vsyncadd [#allocation3], 4294967040 }
  0x35   :  { %579 = dma.done.wait [#allocation6], 4096  }
  0x36   :  { %580 = vsyncadd [#allocation6], 4294963200  ;;  %v61_v0 = vld [vmem:[#allocation5] sm:$0xff]  ;;  %v62_v1 = vld [vmem:[#allocation5 + $0x8] sm:$0xff]  ;;  %s588_s26 = smov [#allocation8]  }
  0x37   :  { %v63_v2 = vld [vmem:[#allocation5 + $0x10] sm:$0xff]  ;;  %v411_v3 = vpack.c.bf16 %v62_v1, %v61_v0  ;;  %v64_v4 = vld [vmem:[#allocation5 + $0x18] sm:$0xff]  ;;  %v65_v6 = vld [vmem:[#allocation5 + $0x20] sm:$0xff] }
  0x38   :  { %v415_v5 = vpack.c.bf16 %v64_v4, %v63_v2  ;;  %v66_v7 = vld [vmem:[#allocation5 + $0x28] sm:$0xff]  ;;  %v59_v9 = vld [vmem:[#allocation2] sm:$0xff]  ;;  %v68_v11 = vld [vmem:[#allocation5 + $0x38] sm:$0xff] }
  0x39   :  { %412 = vmatprep.subr.bf16.mxu0 %v411_v3  ;;  %v419_v8 = vpack.c.bf16 %v66_v7, %v65_v6  ;;  %v67_v10 = vld [vmem:[#allocation5 + $0x30] sm:$0xff]  ;;  %373 = vmatprep.mubr.f32.mxu0 %v59_v9  ;;  %v152_v12 = vmul.f32 %v59_v9, %v59_v9  ;;  %v60_v13 = vld [vmem:[#allocation2 + $0x8] sm:$0xff]  ;;  %v69_v16 = vld [vmem:[#allocation5 + $0x40] sm:$0xff] }
  0x3a   :  { %414 = vmatpush3.bf16.msra.mxu0 %v411_v3  ;;  %v153_v14 = vmul.f32 %v60_v13, %v60_v13  ;;  %v423_v15 = vpack.c.bf16 %v68_v11, %v67_v10  ;;  %v70_v17 = vld [vmem:[#allocation5 + $0x48] sm:$0xff]  ;;  %v71_v19 = vld [vmem:[#allocation5 + $0x50] sm:$0xff]  ;;  %v72_v20 = vld [vmem:[#allocation5 + $0x58] sm:$0xff] }
  0x3b   :  { %416 = vmatprep.subr.bf16.mxu0 %v415_v5  ;;  %154 = vadd.xlane.f32.xlu0 %v152_v12  ;;  %v427_v18 = vpack.c.bf16 %v70_v17, %v69_v16  ;;  %v431_v21 = vpack.c.bf16 %v72_v20, %v71_v19  ;;  %v73_v22 = vld [vmem:[#allocation5 + $0x60] sm:$0xff]  ;;  %v74_v23 = vld [vmem:[#allocation5 + $0x68] sm:$0xff]  ;;  %v75_v25 = vld [vmem:[#allocation5 + $0x70] sm:$0xff] }
  0x3c   :  { %v435_v24 = vpack.c.bf16 %v74_v23, %v73_v22  ;;  %v76_v26 = vld [vmem:[#allocation5 + $0x78] sm:$0xff]  ;;  %v191_v28 = vld [vmem:[#allocation7] sm:$0xff]  ;;  %v192_v29 = vld [vmem:[#allocation7 + $0x8] sm:$0xff] }
  0x3d   :  { %v439_v27 = vpack.c.bf16 %v76_v26, %v75_v25  ;;  %v443_v30 = vpack.c.bf16 %v192_v29, %v191_v28  ;;  %v193_v31 = vld [vmem:[#allocation7 + $0x10] sm:$0xff]  ;;  %v194_v32 = vld [vmem:[#allocation7 + $0x18] sm:$0xff]  ;;  %v195_v33 = vld [vmem:[#allocation7 + $0x20] sm:$0xff] }
  0x3e   :  { %418 = vmatpush3.bf16.msra.mxu0 %v415_v5  ;;  %v447_v34 = vpack.c.bf16 %v194_v32, %v193_v31  ;;  %v196_v35 = vld [vmem:[#allocation7 + $0x28] sm:$0xff]  ;;  %v197_v37 = vld [vmem:[#allocation7 + $0x30] sm:$0xff]  ;;  %v198_v38 = vld [vmem:[#allocation7 + $0x38] sm:$0xff] }
  0x3f   :  { %420 = vmatprep.subr.bf16.mxu0 %v419_v8  ;;  %156 = vadd.xlane.f32.xlu0 %v153_v14  ;;  %v451_v36 = vpack.c.bf16 %v196_v35, %v195_v33  ;;  %v455_v39 = vpack.c.bf16 %v198_v38, %v197_v37  ;;  %v199_v40 = vld [vmem:[#allocation7 + $0x40] sm:$0xff]  ;;  %v200_v41 = vld [vmem:[#allocation7 + $0x48] sm:$0xff]  ;;  %v201_v43 = vld [vmem:[#allocation7 + $0x50] sm:$0xff] }
  0x40   :  { %444 = vmatprep.subr.bf16.mxu1 %v443_v30  ;;  %v459_v42 = vpack.c.bf16 %v200_v41, %v199_v40  ;;  %v202_v44 = vld [vmem:[#allocation7 + $0x58] sm:$0xff]  ;;  %v203_v46 = vld [vmem:[#allocation7 + $0x60] sm:$0xff]  ;;  %v204_v47 = vld [vmem:[#allocation7 + $0x68] sm:$0xff] }
  0x41   :  { %446 = vmatpush3.bf16.msra.mxu1 %v443_v30  ;;  %v463_v45 = vpack.c.bf16 %v202_v44, %v201_v43  ;;  %v467_v48 = vpack.c.bf16 %v204_v47, %v203_v46  ;;  %v205_v49 = vld [vmem:[#allocation7 + $0x70] sm:$0xff]  ;;  %v206_v50 = vld [vmem:[#allocation7 + $0x78] sm:$0xff] }
  0x42   :  { %422 = vmatpush3.bf16.msra.mxu0 %v419_v8  ;;  %448 = vmatprep.subr.bf16.mxu1 %v447_v34  ;;  %v471_v51 = vpack.c.bf16 %v206_v50, %v205_v49  ;;  %v304_v3 = vld [vmem:[%s686_s2] ss:$0 sm:$0xff]  ;;  %s289_s2 = sshll.u32 %s588_s26, 4  ;;  %s290_s2 = int_to_ptr.vmem [resolvable:$true] %s289_s2 }
  0x43   :  { %424 = vmatprep.subr.bf16.mxu0 %v423_v15  ;;  %s555_s29 = scalar_lea.vmem %s290_s2, 256  ;;  %p560_p11 = scmp.lt.s32.totalorder %s290_s2, %s290_s2 }
  0x44   :  { %p556_p10 = scmp.ne.s32.totalorder %s290_s2, %s555_s29  ;;  %p561_p12 = scmp.lt.s32.totalorder %s555_s29, %s555_s29 }
  0x45   :  { %450 = vmatpush3.bf16.msra.mxu1 %v447_v34 }
  0x46   :  { %426 = vmatpush3.bf16.msra.mxu0 %v423_v15  ;;  %452 = vmatprep.subr.bf16.mxu1 %v451_v36  ;;  %p562_p13 = por %p561_p12, %p560_p11 }
  0x47   :  { %428 = vmatprep.subr.bf16.mxu0 %v427_v18 }
  0x48   :  { %p563_p0 = pnand %p562_p13, %p556_p10 }
  0x49   :  { %454 = vmatpush3.bf16.msra.mxu1 %v451_v36 }
  0x4a   :  { %430 = vmatpush3.bf16.msra.mxu0 %v427_v18  ;;  %456 = vmatprep.subr.bf16.mxu1 %v455_v39 }
  0x4b   :  { %432 = vmatprep.subr.bf16.mxu0 %v431_v21 }
  0x4d   :  { %458 = vmatpush3.bf16.msra.mxu1 %v455_v39 }
  0x4e   :  { %434 = vmatpush3.bf16.msra.mxu0 %v431_v21  ;;  %460 = vmatprep.subr.bf16.mxu1 %v459_v42 }
  0x4f   :  { %436 = vmatprep.subr.bf16.mxu0 %v435_v24 }
  0x51   :  { %462 = vmatpush3.bf16.msra.mxu1 %v459_v42 }
  0x52   :  { %438 = vmatpush3.bf16.msra.mxu0 %v435_v24  ;;  %464 = vmatprep.subr.bf16.mxu1 %v463_v45 }
  0x53   :  { %440 = vmatprep.subr.bf16.mxu0 %v439_v27 }
  0x55   :  { %466 = vmatpush3.bf16.msra.mxu1 %v463_v45 }
  0x56   :  { %442 = vmatpush3.bf16.msra.mxu0 %v439_v27  ;;  %468 = vmatprep.subr.bf16.mxu1 %v467_v48 }
  0x59   :  { %374 = vmatmul.mubr.f32.vlgmr.msra.gmra.mrb[0].mxu0 %v60_v13  ;;  %470 = vmatpush3.bf16.msra.mxu1 %v467_v48 }
  0x5a   :  { %472 = vmatprep.subr.bf16.mxu1 %v471_v51 }
  0x5d   :  { %474 = vmatpush3.bf16.msra.mxu1 %v471_v51 }
  0xc8   :  { %v155_v52 = vpop.xlane.xlu0 %154 }
  0xc9   :  { %v302_v55 = vadd.f32 -1.0, %v155_v52 }
  0xcc   :  { %v157_v53 = vpop.xlane.xlu0 %156 }
  0xcd   :  { %v303_v54 = vadd.f32 -1.0, %v157_v53 }
 0x12c   :  { %v375_v56 = vpop.f32.mrb[0].mxu0 }
 0x12d   :  { %v161_v57 = vadd.f32 %v375_v56, %v303_v54  ;;  %v143_v58 = vpop.f32.mrb[1].mxu0 }
 0x12e   :  { %v160_v59 = vadd.f32 %v302_v55, %v143_v58 }
 0x12f   :  { %v163_v60 = vmax.f32 %v161_v57, 0.0 }
 0x130   :  { %v162_v61 = vmax.f32 %v160_v59, 0.0 }
 0x131   :  { %481 = vrsqrt.f32 %v163_v60  ;;  %vm173_vm0 = vcmp.eq.f32.partialorder %v163_v60, inf  ;;  %v176_v2 = vand.u32 2147483648, %v163_v60  ;;  %vm175_vm2 = vcmp.eq.f32.partialorder %v163_v60, 0.0 }
 0x132   :  { %483 = vrsqrt.f32 %v162_v61  ;;  %vm166_vm1 = vcmp.eq.f32.partialorder %v162_v61, inf  ;;  %v169_v4 = vand.u32 2147483648, %v162_v61  ;;  %vm168_vm3 = vcmp.eq.f32.partialorder %v162_v61, 0.0 }
 0x13b   :  { %v482_v62 = vpop.eup %481 }
 0x13c   :  { %v484_v63 = vpop.eup %483  ;;  %v172_v0 = vmul.f32 %v482_v62, %v163_v60 }
 0x13d   :  { %v165_v1 = vmul.f32 %v484_v63, %v162_v61 }
 0x13e   :  { %v174_v5 = vsel %vm173_vm0, %v163_v60, %v172_v0 }
 0x13f   :  { %v167_v6 = vsel %vm166_vm1, %v162_v61, %v165_v1  ;;  %v177_v7 = vsel %vm175_vm2, %v176_v2, %v174_v5 }
 0x140   :  { %v170_v8 = vsel %vm168_vm3, %v169_v4, %v167_v6  ;;  %v186_v9 = vmul.f32 %v304_v3, %v177_v7 }
 0x141   :  { %v185_v10 = vmul.f32 %v304_v3, %v170_v8 }
 0x142   :  { %v189_v11 = vmul.f32 1.442695, %v186_v9 }
 0x143   :  { %v187_v12 = vmul.f32 1.442695, %v185_v10 }
 0x145   :  { %485 = vpow2.f32 %v187_v12 }
 0x146   :  { %487 = vpow2.f32 %v189_v11 }
 0x14f   :  { %v486_v13 = vpop.eup %485 }
 0x150   :  { %v488_v14 = vpop.eup %487  ;;  %408 = vmatprep.mubr.f32.mxu1 %v486_v13 }
 0x151   :  { %409 = vmatmul.mubr.f32.vlgmr.msra.gmra.mrb[0].mxu1 %v488_v14 }
 0x224   :  { %v410_v15 = vpop.f32.mrb[0].mxu1 }
 0x225   :  { %283 = vst [vmem:[#allocation8 + $0x8] sm:$0xff] %v410_v15  ;;  %v273_v16 = vpop.f32.mrb[1].mxu1 }
 0x226   :  { %282 = vst [vmem:[#allocation8] sm:$0xff] %v273_v16 }
 0x227   :  { %566 = shalt.err (!%p563_p0)
}
 0x228   :  { %s567_s6 = scalar_lea.hbm %s688_s4, 256 }
 0x229   :  { %p568_p1 = scmp.ne.s32.totalorder %s688_s4, %s567_s6  ;;  %p571_p2 = scmp.lt.u32.totalorder %s567_s6, %s688_s4 }
 0x22b   :  { %p573_p3 = pnand %p571_p2, %p568_p1 }
 0x22d   :  { %576 = shalt.err (!%p573_p3)
}
 0x22e   :  { %295 = dma.vmem_to_hbm [thread:$0]  %s290_s2, 256, %s688_s4, [#allocation4], %s585_s27, %s585_s27, %s586_s28  }
 0x22f   :  { %581 = dma.done.wait [#allocation4], 256  }
 0x230   :  { %582 = vsyncadd [#allocation4], 4294967040 }
 0x231   :  { %299 = vsyncpa [#allocation3], 1 }
 0x232   :  { %300 = vsyncpa [#allocation6], 1 }
 0x233   :  { %301 = vsyncpa [#allocation4], 1 }

// kernel: tpu_custom_call.1
= control target key start
LH: loop header
LB: loop body
LE: loop exit
PB: predicated region body
PF: predicated region fallthrough
CT: control target
= control target key end

     0   :  { %9 = vsyncpa [#allocation3], 0  ;;  %s684_s0 = inlined_call_operand.hbm [shape: f32[16,128], index: 0, kind: input, shape index: {}]   ;;  %s685_s1 = inlined_call_operand.hbm [shape: f32[128,128], index: 1, kind: input, shape index: {}]   ;;  %s686_s2 = inlined_call_operand.vmem [shape: f32[1,128], index: 2, kind: input, shape index: {}]   ;;  %s687_s3 = inlined_call_operand.hbm [shape: f32[128,128], index: 3, kind: input, shape index: {}]   ;;  %s688_s4 = inlined_call_operand.hbm [shape: f32[16,128], index: 4, kind: output, shape index: {}]  }
   0x1   :  { %10 = vsyncpa [#allocation6], 0 }
   0x2   :  { %11 = vsyncpa [#allocation4], 0  ;;  %s583_s15 = smov [#allocation5]   ;;  %s584_s17 = smov [#allocation2]  }
   0x3   :  { %s29_s16 = sshll.u32 %s583_s15, 4  ;;  %s17_s18 = sshll.u32 %s584_s17, 4  ;;  %s30_s16 = int_to_ptr.vmem [resolvable:$true] %s29_s16  ;;  %s614_s18 = int_to_ptr.vmem [resolvable:$true] %s17_s18 }
   0x4   :  { %s489_s21 = scalar_lea.hbm %s685_s1, 2048 }
   0x5   :  { %p490_p0 = scmp.ne.s32.totalorder %s685_s1, %s489_s21  ;;  %p493_p1 = scmp.lt.u32.totalorder %s489_s21, %s685_s1 }
   0x7   :  { %p495_p2 = pnand %p493_p1, %p490_p0 }
   0x9   :  { %498 = shalt.err (!%p495_p2)
}
   0xa   :  { %s499_s26 = scalar_lea.vmem %s30_s16, 2048  ;;  %p504_p4 = scmp.lt.s32.totalorder %s30_s16, %s30_s16 }
   0xb   :  { %p500_p3 = scmp.ne.s32.totalorder %s30_s16, %s499_s26  ;;  %p505_p5 = scmp.lt.s32.totalorder %s499_s26, %s499_s26 }
   0xd   :  { %p506_p6 = por %p505_p5, %p504_p4 }
   0xf   :  { %p507_p7 = pnand %p506_p6, %p500_p3 }
  0x11   :  { %510 = shalt.err (!%p507_p7)
}
  0x12   :  { %s585_s27 = smov 128   ;;  %s586_s28 = smov 8  }
  0x13   :  { %35 = dma.hbm_to_vmem [thread:$0]  %s685_s1, 2048, %s30_s16, [#allocation6], %s585_s27, %s585_s27, %s586_s28  }
  0x14   :  { %s511_s7 = scalar_lea.hbm %s684_s0, 256 }
  0x15   :  { %p512_p8 = scmp.ne.s32.totalorder %s684_s0, %s511_s7  ;;  %p515_p9 = scmp.lt.u32.totalorder %s511_s7, %s684_s0 }
  0x17   :  { %p517_p10 = pnand %p515_p9, %p512_p8 }
  0x19   :  { %520 = shalt.err (!%p517_p10)
}
  0x1a   :  { %s521_s12 = scalar_lea.vmem %s614_s18, 256  ;;  %p526_p12 = scmp.lt.s32.totalorder %s614_s18, %s614_s18 }
  0x1b   :  { %p522_p11 = scmp.ne.s32.totalorder %s614_s18, %s521_s12  ;;  %p527_p13 = scmp.lt.s32.totalorder %s521_s12, %s521_s12 }
  0x1d   :  { %p528_p0 = por %p527_p13, %p526_p12 }
  0x1f   :  { %p529_p1 = pnand %p528_p0, %p522_p11 }
  0x21   :  { %532 = shalt.err (!%p529_p1)
}
  0x22   :  { %23 = dma.hbm_to_vmem [thread:$0]  %s684_s0, 256, %s614_s18, [#allocation3], %s585_s27, %s585_s27, %s586_s28  }
  0x23   :  { %s587_s14 = smov [#allocation7]   ;;  %s533_s19 = scalar_lea.hbm %s687_s3, 2048 }
  0x24   :  { %s43_s15 = sshll.u32 %s587_s14, 4  ;;  %p534_p2 = scmp.ne.s32.totalorder %s687_s3, %s533_s19  ;;  %s44_s15 = int_to_ptr.vmem [resolvable:$true] %s43_s15 }
  0x25   :  { %p537_p3 = scmp.lt.u32.totalorder %s533_s19, %s687_s3 }
  0x27   :  { %p539_p4 = pnand %p537_p3, %p534_p2 }
  0x29   :  { %542 = shalt.err (!%p539_p4)
}
  0x2a   :  { %s543_s24 = scalar_lea.vmem %s44_s15, 2048  ;;  %p548_p6 = scmp.lt.s32.totalorder %s44_s15, %s44_s15 }
  0x2b   :  { %p544_p5 = scmp.ne.s32.totalorder %s44_s15, %s543_s24  ;;  %p549_p7 = scmp.lt.s32.totalorder %s543_s24, %s543_s24 }
  0x2d   :  { %p550_p8 = por %p549_p7, %p548_p6 }
  0x2f   :  { %p551_p9 = pnand %p550_p8, %p544_p5 }
  0x31   :  { %554 = shalt.err (!%p551_p9)
}
  0x32   :  { %49 = dma.hbm_to_vmem [thread:$0]  %s687_s3, 2048, %s44_s15, [#allocation6], %s585_s27, %s585_s27, %s586_s28  }
  0x33   :  { %577 = dma.done.wait [#allocation3], 256  }
  0x34   :  { %578 = vsyncadd [#allocation3], 4294967040 }
  0x35   :  { %579 = dma.done.wait [#allocation6], 4096  }
  0x36   :  { %580 = vsyncadd [#allocation6], 4294963200  ;;  %v61_v0 = vld [vmem:[#allocation5] sm:$0xff]  ;;  %v62_v1 = vld [vmem:[#allocation5 + $0x8] sm:$0xff]  ;;  %s588_s26 = smov [#allocation8]  }
  0x37   :  { %v63_v2 = vld [vmem:[#allocation5 + $0x10] sm:$0xff]  ;;  %v411_v3 = vpack.c.bf16 %v62_v1, %v61_v0  ;;  %v64_v4 = vld [vmem:[#allocation5 + $0x18] sm:$0xff]  ;;  %v65_v6 = vld [vmem:[#allocation5 + $0x20] sm:$0xff] }
  0x38   :  { %v415_v5 = vpack.c.bf16 %v64_v4, %v63_v2  ;;  %v66_v7 = vld [vmem:[#allocation5 + $0x28] sm:$0xff]  ;;  %v59_v9 = vld [vmem:[#allocation2] sm:$0xff]  ;;  %v68_v11 = vld [vmem:[#allocation5 + $0x38] sm:$0xff] }
  0x39   :  { %412 = vmatprep.subr.bf16.mxu0 %v411_v3  ;;  %v419_v8 = vpack.c.bf16 %v66_v7, %v65_v6  ;;  %v67_v10 = vld [vmem:[#allocation5 + $0x30] sm:$0xff]  ;;  %373 = vmatprep.mubr.f32.mxu0 %v59_v9  ;;  %v152_v12 = vmul.f32 %v59_v9, %v59_v9  ;;  %v60_v13 = vld [vmem:[#allocation2 + $0x8] sm:$0xff]  ;;  %v69_v16 = vld [vmem:[#allocation5 + $0x40] sm:$0xff] }
  0x3a   :  { %414 = vmatpush3.bf16.msra.mxu0 %v411_v3  ;;  %v153_v14 = vmul.f32 %v60_v13, %v60_v13  ;;  %v423_v15 = vpack.c.bf16 %v68_v11, %v67_v10  ;;  %v70_v17 = vld [vmem:[#allocation5 + $0x48] sm:$0xff]  ;;  %v71_v19 = vld [vmem:[#allocation5 + $0x50] sm:$0xff]  ;;  %v72_v20 = vld [vmem:[#allocation5 + $0x58] sm:$0xff] }
  0x3b   :  { %416 = vmatprep.subr.bf16.mxu0 %v415_v5  ;;  %154 = vadd.xlane.f32.xlu0 %v152_v12  ;;  %v427_v18 = vpack.c.bf16 %v70_v17, %v69_v16  ;;  %v431_v21 = vpack.c.bf16 %v72_v20, %v71_v19  ;;  %v73_v22 = vld [vmem:[#allocation5 + $0x60] sm:$0xff]  ;;  %v74_v23 = vld [vmem:[#allocation5 + $0x68] sm:$0xff]  ;;  %v75_v25 = vld [vmem:[#allocation5 + $0x70] sm:$0xff] }
  0x3c   :  { %v435_v24 = vpack.c.bf16 %v74_v23, %v73_v22  ;;  %v76_v26 = vld [vmem:[#allocation5 + $0x78] sm:$0xff]  ;;  %v191_v28 = vld [vmem:[#allocation7] sm:$0xff]  ;;  %v192_v29 = vld [vmem:[#allocation7 + $0x8] sm:$0xff] }
  0x3d   :  { %v439_v27 = vpack.c.bf16 %v76_v26, %v75_v25  ;;  %v443_v30 = vpack.c.bf16 %v192_v29, %v191_v28  ;;  %v193_v31 = vld [vmem:[#allocation7 + $0x10] sm:$0xff]  ;;  %v194_v32 = vld [vmem:[#allocation7 + $0x18] sm:$0xff]  ;;  %v195_v33 = vld [vmem:[#allocation7 + $0x20] sm:$0xff] }
  0x3e   :  { %418 = vmatpush3.bf16.msra.mxu0 %v415_v5  ;;  %v447_v34 = vpack.c.bf16 %v194_v32, %v193_v31  ;;  %v196_v35 = vld [vmem:[#allocation7 + $0x28] sm:$0xff]  ;;  %v197_v37 = vld [vmem:[#allocation7 + $0x30] sm:$0xff]  ;;  %v198_v38 = vld [vmem:[#allocation7 + $0x38] sm:$0xff] }
  0x3f   :  { %420 = vmatprep.subr.bf16.mxu0 %v419_v8  ;;  %156 = vadd.xlane.f32.xlu0 %v153_v14  ;;  %v451_v36 = vpack.c.bf16 %v196_v35, %v195_v33  ;;  %v455_v39 = vpack.c.bf16 %v198_v38, %v197_v37  ;;  %v199_v40 = vld [vmem:[#allocation7 + $0x40] sm:$0xff]  ;;  %v200_v41 = vld [vmem:[#allocation7 + $0x48] sm:$0xff]  ;;  %v201_v43 = vld [vmem:[#allocation7 + $0x50] sm:$0xff] }
  0x40   :  { %444 = vmatprep.subr.bf16.mxu1 %v443_v30  ;;  %v459_v42 = vpack.c.bf16 %v200_v41, %v199_v40  ;;  %v202_v44 = vld [vmem:[#allocation7 + $0x58] sm:$0xff]  ;;  %v203_v46 = vld [vmem:[#allocation7 + $0x60] sm:$0xff]  ;;  %v204_v47 = vld [vmem:[#allocation7 + $0x68] sm:$0xff] }
  0x41   :  { %446 = vmatpush3.bf16.msra.mxu1 %v443_v30  ;;  %v463_v45 = vpack.c.bf16 %v202_v44, %v201_v43  ;;  %v467_v48 = vpack.c.bf16 %v204_v47, %v203_v46  ;;  %v205_v49 = vld [vmem:[#allocation7 + $0x70] sm:$0xff]  ;;  %v206_v50 = vld [vmem:[#allocation7 + $0x78] sm:$0xff] }
  0x42   :  { %422 = vmatpush3.bf16.msra.mxu0 %v419_v8  ;;  %448 = vmatprep.subr.bf16.mxu1 %v447_v34  ;;  %v471_v51 = vpack.c.bf16 %v206_v50, %v205_v49  ;;  %v304_v3 = vld [vmem:[%s686_s2] ss:$0 sm:$0xff]  ;;  %s289_s2 = sshll.u32 %s588_s26, 4  ;;  %s290_s2 = int_to_ptr.vmem [resolvable:$true] %s289_s2 }
  0x43   :  { %424 = vmatprep.subr.bf16.mxu0 %v423_v15  ;;  %s555_s29 = scalar_lea.vmem %s290_s2, 256  ;;  %p560_p11 = scmp.lt.s32.totalorder %s290_s2, %s290_s2 }
  0x44   :  { %p556_p10 = scmp.ne.s32.totalorder %s290_s2, %s555_s29  ;;  %p561_p12 = scmp.lt.s32.totalorder %s555_s29, %s555_s29 }
  0x45   :  { %450 = vmatpush3.bf16.msra.mxu1 %v447_v34 }
  0x46   :  { %426 = vmatpush3.bf16.msra.mxu0 %v423_v15  ;;  %452 = vmatprep.subr.bf16.mxu1 %v451_v36  ;;  %p562_p13 = por %p561_p12, %p560_p11 }
  0x47   :  { %428 = vmatprep.subr.bf16.mxu0 %v427_v18 }
  0x48   :  { %p563_p0 = pnand %p562_p13, %p556_p10 }
  0x49   :  { %454 = vmatpush3.bf16.msra.mxu1 %v451_v36 }
  0x4a   :  { %430 = vmatpush3.bf16.msra.mxu0 %v427_v18  ;;  %456 = vmatprep.subr.bf16.mxu1 %v455_v39 }
  0x4b   :  { %432 = vmatprep.subr.bf16.mxu0 %v431_v21 }
  0x4d   :  { %458 = vmatpush3.bf16.msra.mxu1 %v455_v39 }
  0x4e   :  { %434 = vmatpush3.bf16.msra.mxu0 %v431_v21  ;;  %460 = vmatprep.subr.bf16.mxu1 %v459_v42 }
  0x4f   :  { %436 = vmatprep.subr.bf16.mxu0 %v435_v24 }
  0x51   :  { %462 = vmatpush3.bf16.msra.mxu1 %v459_v42 }
  0x52   :  { %438 = vmatpush3.bf16.msra.mxu0 %v435_v24  ;;  %464 = vmatprep.subr.bf16.mxu1 %v463_v45 }
  0x53   :  { %440 = vmatprep.subr.bf16.mxu0 %v439_v27 }
  0x55   :  { %466 = vmatpush3.bf16.msra.mxu1 %v463_v45 }
  0x56   :  { %442 = vmatpush3.bf16.msra.mxu0 %v439_v27  ;;  %468 = vmatprep.subr.bf16.mxu1 %v467_v48 }
  0x59   :  { %374 = vmatmul.mubr.f32.vlgmr.msra.gmra.mrb[0].mxu0 %v60_v13  ;;  %470 = vmatpush3.bf16.msra.mxu1 %v467_v48 }
  0x5a   :  { %472 = vmatprep.subr.bf16.mxu1 %v471_v51 }
  0x5d   :  { %474 = vmatpush3.bf16.msra.mxu1 %v471_v51 }
  0xc8   :  { %v155_v52 = vpop.xlane.xlu0 %154 }
  0xc9   :  { %v302_v55 = vadd.f32 -1.0, %v155_v52 }
  0xcc   :  { %v157_v53 = vpop.xlane.xlu0 %156 }
  0xcd   :  { %v303_v54 = vadd.f32 -1.0, %v157_v53 }
 0x12c   :  { %v375_v56 = vpop.f32.mrb[0].mxu0 }
 0x12d   :  { %v161_v57 = vadd.f32 %v375_v56, %v303_v54  ;;  %v143_v58 = vpop.f32.mrb[1].mxu0 }
 0x12e   :  { %v160_v59 = vadd.f32 %v302_v55, %v143_v58 }
 0x12f   :  { %v163_v60 = vmax.f32 %v161_v57, 0.0 }
 0x130   :  { %v162_v61 = vmax.f32 %v160_v59, 0.0 }
 0x131   :  { %481 = vrsqrt.f32 %v163_v60  ;;  %vm173_vm0 = vcmp.eq.f32.partialorder %v163_v60, inf  ;;  %v176_v2 = vand.u32 2147483648, %v163_v60  ;;  %vm175_vm2 = vcmp.eq.f32.partialorder %v163_v60, 0.0 }
 0x132   :  { %483 = vrsqrt.f32 %v162_v61  ;;  %vm166_vm1 = vcmp.eq.f32.partialorder %v162_v61, inf  ;;  %v169_v4 = vand.u32 2147483648, %v162_v61  ;;  %vm168_vm3 = vcmp.eq.f32.partialorder %v162_v61, 0.0 }
 0x13b   :  { %v482_v62 = vpop.eup %481 }
 0x13c   :  { %v484_v63 = vpop.eup %483  ;;  %v172_v0 = vmul.f32 %v482_v62, %v163_v60 }
 0x13d   :  { %v165_v1 = vmul.f32 %v484_v63, %v162_v61 }
 0x13e   :  { %v174_v5 = vsel %vm173_vm0, %v163_v60, %v172_v0 }
 0x13f   :  { %v167_v6 = vsel %vm166_vm1, %v162_v61, %v165_v1  ;;  %v177_v7 = vsel %vm175_vm2, %v176_v2, %v174_v5 }
 0x140   :  { %v170_v8 = vsel %vm168_vm3, %v169_v4, %v167_v6  ;;  %v186_v9 = vmul.f32 %v304_v3, %v177_v7 }
 0x141   :  { %v185_v10 = vmul.f32 %v304_v3, %v170_v8 }
 0x142   :  { %v189_v11 = vmul.f32 1.442695, %v186_v9 }
 0x143   :  { %v187_v12 = vmul.f32 1.442695, %v185_v10 }
 0x145   :  { %485 = vpow2.f32 %v187_v12 }
 0x146   :  { %487 = vpow2.f32 %v189_v11 }
 0x14f   :  { %v486_v13 = vpop.eup %485 }
 0x150   :  { %v488_v14 = vpop.eup %487  ;;  %408 = vmatprep.mubr.f32.mxu1 %v486_v13 }
 0x151   :  { %409 = vmatmul.mubr.f32.vlgmr.msra.gmra.mrb[0].mxu1 %v488_v14 }
 0x224   :  { %v410_v15 = vpop.f32.mrb[0].mxu1 }
 0x225   :  { %283 = vst [vmem:[#allocation8 + $0x8] sm:$0xff] %v410_v15  ;;  %v273_v16 = vpop.f32.mrb[1].mxu1 }
 0x226   :  { %282 = vst [vmem:[#allocation8] sm:$0xff] %v273_v16 }
 0x227   :  { %566 = shalt.err (!%p563_p0)
}
 0x228   :  { %s567_s6 = scalar_lea.hbm %s688_s4, 256 }
 0x229   :  { %p568_p1 = scmp.ne.s32.totalorder %s688_s4, %s567_s6  ;;  %p571_p2 = scmp.lt.u32.totalorder %s567_s6, %s688_s4 }
 0x22b   :  { %p573_p3 = pnand %p571_p2, %p568_p1 }
 0x22d   :  { %576 = shalt.err (!%p573_p3)
}
 0x22e   :  { %295 = dma.vmem_to_hbm [thread:$0]  %s290_s2, 256, %s688_s4, [#allocation4], %s585_s27, %s585_s27, %s586_s28  }
 0x22f   :  { %581 = dma.done.wait [#allocation4], 256  }
 0x230   :  { %582 = vsyncadd [#allocation4], 4294967040 }
 0x231   :  { %299 = vsyncpa [#allocation3], 1 }
 0x232   :  { %300 = vsyncpa [#allocation6], 1 }
 0x233   :  { %301 = vsyncpa [#allocation4], 1 }

</bundles_post_ra>
